<compile_context>
chip_gen: v6e
topology: v6e:2x2x1
jax: 0.10.0
libtpu: 0.0.40
codegen_flags: <defaults>
</compile_context>

<pallas_src>
import jax
import jax.numpy as jnp
from jax.experimental import pallas as pl
from jax.experimental.pallas import tpu as pltpu

N_IN = 6
N_HID = 24
N_OUT = 3

LANE = 128        # vreg lane width
TB_MAX = 4096     # max lanes (batch rows) per grid step


def policy_kernel(x_ref, w1_ref, b1_ref, w2_ref, b2_ref, out_ref):
    x = x_ref[...]                                   # (N_IN, TB) f32, batch on lanes

    # fc1 on the MXU: (N_HID, N_IN) @ (N_IN, TB) -> (N_HID, TB), f32 accumulate.
    h = jnp.dot(w1_ref[...], x, preferred_element_type=jnp.float32) + b1_ref[...]
    h = jnp.maximum(h, 0.0)

    # fc2 on the MXU: (N_OUT, N_HID) @ (N_HID, TB) -> (N_OUT, TB).
    logits = jnp.dot(w2_ref[...], h, preferred_element_type=jnp.float32) + b2_ref[...]

    # Packed softmax over the 3 feature rows (per-lane; tiny sublane reduce).
    m = jnp.max(logits, axis=0, keepdims=True)        # (1, TB)
    e = jnp.exp(logits - m)                           # (3, TB) — single EUP slab
    s = jnp.sum(e, axis=0, keepdims=True)             # (1, TB)
    out_ref[...] = e / s                              # exact normalization


def _round_up(v, m):
    return ((v + m - 1) // m) * m


def _policy_forward_impl(x, w1, b1, w2, b2):
    """x: (B, 6) f32. w1: (24, 6), b1: (24,), w2: (3, 24), b2: (3,) — PyTorch layout."""
    B = x.shape[0]

    # ---- batch tiling -------------------------------------------------------
    b_lane = _round_up(B, LANE)
    n_tiles = max(1, -(-b_lane // TB_MAX))            # cdiv
    if b_lane >= 2 * LANE:
        n_tiles = max(n_tiles, 2)                     # give both v7x TCs work
    if n_tiles > 1 and n_tiles % 2:
        n_tiles += 1                                  # even split across 2 TCs
    tb = _round_up(-(-b_lane // n_tiles), LANE)
    b_pad = tb * n_tiles

    # Transposed, lane-padded activations.  Padded columns are zero-filled, so
    # their (discarded) softmax columns are finite; they are sliced away below.
    xt = jnp.pad(jnp.asarray(x, jnp.float32).T, ((0, 0), (0, b_pad - B)))
    w1f = jnp.asarray(w1, jnp.float32)                    # (N_HID, N_IN)
    w2f = jnp.asarray(w2, jnp.float32)                    # (N_OUT, N_HID)
    b1c = jnp.asarray(b1, jnp.float32).reshape(N_HID, 1)  # column biases
    b2c = jnp.asarray(b2, jnp.float32).reshape(N_OUT, 1)

    cost = pl.CostEstimate(
        flops=2 * b_pad * (N_IN * N_HID + N_HID * N_OUT),
        transcendentals=b_pad * N_OUT,                 # 3 exp / sample
        bytes_accessed=4 * (b_pad * (N_IN + N_OUT)
                            + N_HID * (N_IN + 1) + N_OUT * (N_HID + 1)),
    )

    out_t = pl.pallas_call(
        policy_kernel,
        out_shape=jax.ShapeDtypeStruct((N_OUT, b_pad), jnp.float32),
        grid=(n_tiles,),
        in_specs=[
            pl.BlockSpec((N_IN, tb), lambda i: (0, i)),        # x tile (lane-dense)
            pl.BlockSpec((N_HID, N_IN), lambda i: (0, 0)),     # w1 (resident)
            pl.BlockSpec((N_HID, 1), lambda i: (0, 0)),        # b1
            pl.BlockSpec((N_OUT, N_HID), lambda i: (0, 0)),    # w2
            pl.BlockSpec((N_OUT, 1), lambda i: (0, 0)),        # b2
        ],
        out_specs=pl.BlockSpec((N_OUT, tb), lambda i: (0, i)),
        compiler_params=pltpu.CompilerParams(
            dimension_semantics=("parallel",),        # megacore sharding on v7x
            vmem_limit_bytes=32 * 1024 * 1024,        # v7x-safe explicit budget
        ),
        cost_estimate=cost,
    )(xt, w1f, b1c, w2f, b2c)

    return out_t[:, :B].T                             # back to (B, 3)


policy_forward = jax.jit(_policy_forward_impl)


def _ref_forward(x, w1, b1, w2, b2):
    h = jnp.maximum(x @ w1.T + b1, 0.0)
    logits = h @ w2.T + b2
    return jax.nn.softmax(logits, axis=1)


if __name__ == "__main__":
    key = jax.random.PRNGKey(0)
    k_x, k_w1, k_b1, k_w2, k_b2, k_x2 = jax.random.split(key, 6)

    # Deterministic init mimicking nn.Linear's uniform(-1/sqrt(fan_in), 1/sqrt(fan_in))
    bound1 = 1.0 / (N_IN ** 0.5)
    bound2 = 1.0 / (N_HID ** 0.5)
    w1 = jax.random.uniform(k_w1, (N_HID, N_IN), jnp.float32, -bound1, bound1)
    b1 = jax.random.uniform(k_b1, (N_HID,), jnp.float32, -bound1, bound1)
    w2 = jax.random.uniform(k_w2, (N_OUT, N_HID), jnp.float32, -bound2, bound2)
    b2 = jax.random.uniform(k_b2, (N_OUT,), jnp.float32, -bound2, bound2)

    # Small batch of acrobot states (6 features each) — single 128-lane tile.
    B = 8
    x = jax.random.normal(k_x, (B, N_IN), dtype=jnp.float32)
    out = jax.block_until_ready(policy_forward(x, w1, b1, w2, b2))
    ref = _ref_forward(x, w1, b1, w2, b2)
    assert out.shape == (B, N_OUT)
    assert jnp.allclose(out, ref, atol=2e-3, rtol=2e-3)
    # Exact normalization now (plain divide), so a tight sum check holds.
    assert jnp.allclose(jnp.sum(out, axis=1), 1.0, atol=1e-5)

    # Larger batch to exercise the multi-tile, double-buffered "parallel" grid.
    B2 = 600
    x2 = jax.random.normal(k_x2, (B2, N_IN), dtype=jnp.float32)
    out2 = jax.block_until_ready(policy_forward(x2, w1, b1, w2, b2))
    ref2 = _ref_forward(x2, w1, b1, w2, b2)
    assert out2.shape == (B2, N_OUT)
    assert jnp.allclose(out2, ref2, atol=2e-3, rtol=2e-3)
    assert jnp.allclose(jnp.sum(out2, axis=1), 1.0, atol=1e-5)

    print("KERNEL_OK")
</pallas_src>

<mosaic_0001>
module attributes {stable_mosaic.version = 11 : i64} {
  func.func @policy_kernel(%arg0: i32, %arg1: memref<6x128xf32, #tpu.memory_space<vmem>>, %arg2: memref<24x6xf32, #tpu.memory_space<vmem>>, %arg3: memref<24x1xf32, #tpu.memory_space<vmem>>, %arg4: memref<3x24xf32, #tpu.memory_space<vmem>>, %arg5: memref<3x1xf32, #tpu.memory_space<vmem>>, %arg6: memref<3x128xf32, #tpu.memory_space<vmem>>) attributes {dimension_semantics = [#tpu.dimension_semantics<parallel>], iteration_bounds = array<i64: 1>, scalar_prefetch = 0 : i64, scratch_operands = 0 : i64, tpu.core_type = #tpu.core_type<tc>, window_params = [{transform_indices = @transform_0, window_bounds = array<i64: 6, 128>}, {pipeline_mode = #tpu.pipeline_mode<synchronous>, transform_indices = @transform_1, window_bounds = array<i64: 24, 6>}, {pipeline_mode = #tpu.pipeline_mode<synchronous>, transform_indices = @transform_2, window_bounds = array<i64: 24, 1>}, {pipeline_mode = #tpu.pipeline_mode<synchronous>, transform_indices = @transform_3, window_bounds = array<i64: 3, 24>}, {pipeline_mode = #tpu.pipeline_mode<synchronous>, transform_indices = @transform_4, window_bounds = array<i64: 3, 1>}, {transform_indices = @transform_5, window_bounds = array<i64: 3, 128>}]} {
    %c0 = arith.constant 0 : index
    %c0_0 = arith.constant 0 : index
    %0 = vector.load %arg1[%c0, %c0_0] : memref<6x128xf32, #tpu.memory_space<vmem>>, vector<6x128xf32>
    %c0_1 = arith.constant 0 : index
    %c0_2 = arith.constant 0 : index
    %1 = vector.load %arg2[%c0_1, %c0_2] : memref<24x6xf32, #tpu.memory_space<vmem>>, vector<24x6xf32>
    %cst = arith.constant dense<0.000000e+00> : vector<24x128xf32>
    %2 = tpu.matmul %1, %0, %cst {dimension_numbers = #tpu.dot_dimension_numbers<[1], [0], [0], [1], [0, 0, 1, 1], [], []>} : vector<24x6xf32>, vector<6x128xf32>, vector<24x128xf32> -> vector<24x128xf32>
    %c0_3 = arith.constant 0 : index
    %c0_4 = arith.constant 0 : index
    %3 = vector.load %arg3[%c0_3, %c0_4] : memref<24x1xf32, #tpu.memory_space<vmem>>, vector<24x1xf32>
    %4 = vector.broadcast %3 : vector<24x1xf32> to vector<24x128xf32>
    %5 = arith.addf %2, %4 : vector<24x128xf32>
    %cst_5 = arith.constant 0.000000e+00 : f32
    %6 = vector.broadcast %cst_5 : f32 to vector<24x128xf32>
    %7 = arith.maximumf %5, %6 : vector<24x128xf32>
    %c0_6 = arith.constant 0 : index
    %c0_7 = arith.constant 0 : index
    %8 = vector.load %arg4[%c0_6, %c0_7] : memref<3x24xf32, #tpu.memory_space<vmem>>, vector<3x24xf32>
    %cst_8 = arith.constant dense<0.000000e+00> : vector<3x128xf32>
    %9 = tpu.matmul %8, %7, %cst_8 {dimension_numbers = #tpu.dot_dimension_numbers<[1], [0], [0], [1], [0, 0, 1, 1], [], []>} : vector<3x24xf32>, vector<24x128xf32>, vector<3x128xf32> -> vector<3x128xf32>
    %c0_9 = arith.constant 0 : index
    %c0_10 = arith.constant 0 : index
    %10 = vector.load %arg5[%c0_9, %c0_10] : memref<3x1xf32, #tpu.memory_space<vmem>>, vector<3x1xf32>
    %11 = vector.broadcast %10 : vector<3x1xf32> to vector<3x128xf32>
    %12 = arith.addf %9, %11 : vector<3x128xf32>
    %cst_11 = arith.constant dense<0xFF800000> : vector<128xf32>
    %13 = vector.multi_reduction <maximumf>, %12, %cst_11 [0] : vector<3x128xf32> to vector<128xf32>
    %14 = vector.shape_cast %13 : vector<128xf32> to vector<1x128xf32>
    %15 = vector.broadcast %14 : vector<1x128xf32> to vector<3x128xf32>
    %16 = arith.subf %12, %15 : vector<3x128xf32>
    %17 = math.exp %16 : vector<3x128xf32>
    %cst_12 = arith.constant dense<0.000000e+00> : vector<128xf32>
    %18 = vector.multi_reduction <add>, %17, %cst_12 [0] : vector<3x128xf32> to vector<128xf32>
    %19 = vector.shape_cast %18 : vector<128xf32> to vector<1x128xf32>
    %20 = vector.broadcast %19 : vector<1x128xf32> to vector<3x128xf32>
    %21 = arith.divf %17, %20 : vector<3x128xf32>
    %c0_13 = arith.constant 0 : index
    %c0_14 = arith.constant 0 : index
    %22 = vector.load %arg6[%c0_13, %c0_14] : memref<3x128xf32, #tpu.memory_space<vmem>>, vector<3x128xf32>
    tpu.vector_store %arg6[%c0_13, %c0_14], %21 {strides = array<i32>} : memref<3x128xf32, #tpu.memory_space<vmem>>, vector<3x128xf32>,
    return
  }
  func.func @transform_0(%arg0: i32) -> (i32, i32) {
    %c0_i32 = arith.constant 0 : i32
    %c0_i32_0 = arith.constant 0 : i32
    return %c0_i32, %arg0 : i32, i32
  }
  func.func @transform_1(%arg0: i32) -> (i32, i32) {
    %c0_i32 = arith.constant 0 : i32
    %c0_i32_0 = arith.constant 0 : i32
    %c0_i32_1 = arith.constant 0 : i32
    return %c0_i32, %c0_i32_0 : i32, i32
  }
  func.func @transform_2(%arg0: i32) -> (i32, i32) {
    %c0_i32 = arith.constant 0 : i32
    %c0_i32_0 = arith.constant 0 : i32
    %c0_i32_1 = arith.constant 0 : i32
    return %c0_i32, %c0_i32_0 : i32, i32
  }
  func.func @transform_3(%arg0: i32) -> (i32, i32) {
    %c0_i32 = arith.constant 0 : i32
    %c0_i32_0 = arith.constant 0 : i32
    %c0_i32_1 = arith.constant 0 : i32
    return %c0_i32, %c0_i32_0 : i32, i32
  }
  func.func @transform_4(%arg0: i32) -> (i32, i32) {
    %c0_i32 = arith.constant 0 : i32
    %c0_i32_0 = arith.constant 0 : i32
    %c0_i32_1 = arith.constant 0 : i32
    return %c0_i32, %c0_i32_0 : i32, i32
  }
  func.func @transform_5(%arg0: i32) -> (i32, i32) {
    %c0_i32 = arith.constant 0 : i32
    %c0_i32_0 = arith.constant 0 : i32
    return %c0_i32, %arg0 : i32, i32
  }
}

</mosaic_0001>

<bundles_post_ra>
// kernel: _policy_forward_impl.1
= control target key start
LH: loop header
LB: loop body
LE: loop exit
PB: predicated region body
PF: predicated region fallthrough
CT: control target
= control target key end

     0   :  { %vm52_vm0 = vcmask 1045504   ;;  %vm42_vm1 = vcmask 48128   ;;  %v287_v0 = vmov 0.0   ;;  %vm288_vm2 = vmmov 0   ;;  %s357_s0 = inlined_call_operand.vmem [shape: f32[6,128], index: 0, kind: input, shape index: {}]   ;;  %s358_s1 = inlined_call_operand.vmem [shape: f32[24,6], index: 1, kind: input, shape index: {}]   ;;  %s359_s2 = inlined_call_operand.vmem [shape: f32[24,1], index: 2, kind: input, shape index: {}]   ;;  %s360_s4 = inlined_call_operand.vmem [shape: f32[3,1], index: 4, kind: input, shape index: {}]   ;;  %s361_s3 = inlined_call_operand.vmem [shape: f32[3,24], index: 3, kind: input, shape index: {}]   ;;  %s362_s5 = inlined_call_operand.vmem [shape: f32[3,128], index: 5, kind: output, shape index: {}]  }
   0x1   :  { %258 = vmatprep.subr.mxu0 %v287_v0  ;;  %v20_v1 = vld [vmem:[%s357_s0] sm:$0x3f]  ;;  %260 = vmatprep.mubr.msk.f32.mxu0 %vm288_vm2, %v287_v0  ;;  %v289_v3 = vmov 0   ;;  %v26_v4 = vld [vmem:[%s359_s2 + $0x10] sm:$0xff]  ;;  %v22_v6 = vld [vmem:[%s358_s1 + $0x8] sm:$0xff]  ;;  %vm146_vm3 = vcmask 195584  }
   0x2   :  { %v21_v2 = vld [vmem:[%s358_s1] sm:$0xff]  ;;  %259 = vmatpush3.msk.msra.mxu0 %vm52_vm0, %v20_v1  ;;  %282 = vset.pattern.permute.xlu1 %v289_v3  ;;  %v25_v7 = vld [vmem:[%s359_s2 + $0x8] sm:$0xff]  ;;  %v23_v9 = vld [vmem:[%s358_s1 + $0x10] sm:$0xff]  ;;  %vm220_vm4 = vcmask 1042432  }
   0x3   :  { %v24_v5 = vld [vmem:[%s359_s2] sm:$0xff]  ;;  %261 = vmatmul.mubr.msk.f32.vlgmr.msra.gmra.mxu0 %vm42_vm1, %v21_v2  ;;  %281 = vset.pattern.permute.xlu0 %v289_v3 }
   0x4   :  { %263 = vmatprep.mubr.msk.f32.mxu0 %vm288_vm2, %v287_v0  ;;  %39 = vperm.xlu0 %281, %v26_v4   ;;  %v140_v8 = vld [vmem:[%s360_s4] sm:$0x7] }
   0x5   :  { %29 = vperm.xlu1 %282, %v24_v5   ;;  %269 = vmatprep.subr.mxu1 %v287_v0  ;;  %v139_v25 = vld [vmem:[%s361_s3] sm:$0x7] }
   0x6   :  { %275 = vmatprep.mubr.msk.f32.mxu1 %vm288_vm2, %v287_v0 }
   0x7   :  { %264 = vmatmul.mubr.msk.f32.gmra.mxu0 %vm42_vm1, %v22_v6 }
   0x8   :  { %266 = vmatprep.mubr.msk.f32.mxu0 %vm288_vm2, %v287_v0  ;;  %34 = vperm.xlu0 %281, %v25_v7  }
   0x9   :  { %143 = vperm.xlu1 %282, %v140_v8  }
   0xb   :  { %267 = vmatmul.mubr.msk.f32.gmra.mxu0 %vm42_vm1, %v23_v9 }
  0x7f   :  { %v40_v10 = vpop.permute.xlu0 %39 }
  0x80   :  { %v30_v16 = vpop.permute.xlu1 %29 }
  0x83   :  { %v35_v14 = vpop.permute.xlu0 %34 }
  0x84   :  { %v144_v26 = vpop.permute.xlu1 %143 }
  0xc3   :  { %v122_v11 = vpop.f32.mrf.mxu0 }
  0xc4   :  { %v123_v21 = vadd.f32 %v122_v11, %v30_v16 }
  0xc5   :  { %v262_v12 = vpop.f32.mrf.mxu0 }
  0xc6   :  { %v136_v24 = vmax.f32 %v123_v21, 0.0 }
  0xc7   :  { %v127_v13 = vpop.f32.mrf.mxu0 }
  0xc8   :  { %v128_v18 = vadd.f32 %v127_v13, %v35_v14 }
  0xc9   :  { %v265_v15 = vpop.f32.mrf.mxu0 }
  0xca   :  { %v137_v23 = vmax.f32 %v128_v18, 0.0 }
  0xcb   :  { %v132_v17 = vpop.f32.mrf.mxu0 }
  0xcc   :  { %v133_v19 = vadd.f32 %v132_v17, %v40_v10 }
  0xcd   :  { %v268_v20 = vpop.f32.mrf.mxu0 }
  0xce   :  { %v138_v22 = vmax.f32 %v133_v19, 0.0 }
  0xd0   :  { %270 = vmatpush3.msra.mxu1 %v138_v22 }
  0xd1   :  { %271 = vmatprep.subr.mxu1 %v287_v0 }
  0xd2   :  { %272 = vmatpush3.msra.mxu1 %v137_v23 }
  0xd3   :  { %273 = vmatprep.subr.mxu1 %v287_v0 }
  0xd4   :  { %274 = vmatpush3.msra.mxu1 %v136_v24 }
  0xd5   :  { %276 = vmatmul.mubr.msk.f32.vlgmr.msra.gmra.mxu1 %vm146_vm3, %v139_v25 }
 0x195   :  { %v216_v27 = vpop.f32.mrf.mxu1 }
 0x196   :  { %v217_v28 = vadd.f32 %v216_v27, %v144_v26 }
 0x197   :  { %v277_v29 = vpop.f32.mrf.mxu1 }
 0x198   :  { %v221_v30 = vsel %vm220_vm4, %v217_v28, -inf }
 0x199   :  { %v222_v31 = vrot.slane %v221_v30, 4 }
 0x19b   :  { %v223_v32 = vmax.f32 %v221_v30, %v222_v31 }
 0x19d   :  { %v224_v33 = vrot.slane %v223_v32, 2 }
 0x19f   :  { %v225_v34 = vmax.f32 %v223_v32, %v224_v33 }
 0x1a1   :  { %v226_v35 = vrot.slane %v225_v34, 1 }
 0x1a3   :  { %v227_v36 = vmax.f32 %v225_v34, %v226_v35 }
 0x1a5   :  { %v228_v37 = vsub.f32 %v217_v28, %v227_v36 }
 0x1a7   :  { %v229_v38 = vmul.f32 1.442695, %v228_v37 }
 0x1a9   :  { %283 = vpow2.f32 %v229_v38 }
 0x1b6   :  { %v284_v39 = vpop.eup %283 }
 0x1b7   :  { %v231_v40 = vsel %vm220_vm4, %v284_v39, 0.0 }
 0x1b8   :  { %v232_v41 = vrot.slane %v231_v40, 4 }
 0x1ba   :  { %v233_v42 = vadd.f32 %v232_v41, %v231_v40 }
 0x1bc   :  { %v234_v43 = vrot.slane %v233_v42, 2 }
 0x1be   :  { %v235_v44 = vadd.f32 %v234_v43, %v233_v42 }
 0x1c0   :  { %v236_v45 = vrot.slane %v235_v44, 1 }
 0x1c2   :  { %v237_v46 = vadd.f32 %v236_v45, %v235_v44 }
 0x1c4   :  { %285 = vrcp.f32 %v237_v46 }
 0x1d1   :  { %v286_v47 = vpop.eup %285 }
 0x1d2   :  { %v239_v48 = vmul.f32 %v286_v47, %v284_v39 }
 0x1d4   :  { %240 = vst [vmem:[%s362_s5] sm:$0x7] %v239_v48 }

</bundles_post_ra>
